<compile_context>
chip_gen: v5e
topology: v5e:2x2
jax: 0.10.0
libtpu: 0.0.40
codegen_flags: <defaults>
</compile_context>

<pallas_src>
import functools

import jax
import jax.numpy as jnp
from jax.experimental import pallas as pl
from jax.experimental.pallas import tpu as pltpu


D_IN, D_H1, D_H2, D_OUT = 10, 50, 20, 11


def _mlp_kernel(x_ref, w1_ref, b1_ref, w2_ref, b2_ref, w3_ref, b3_ref, o_ref):
    # x tile: [D_IN, block_b]  (batch on the lane axis -> lane-dense)
    # weights: PyTorch-native [out, in]; biases: [out, 1] (broadcast over lanes)
    x = x_ref[...]

    h1 = jnp.dot(w1_ref[...], x, preferred_element_type=jnp.float32) + b1_ref[...]
    h1 = jnp.maximum(h1, 0.0)

    h2 = jnp.dot(w2_ref[...], h1, preferred_element_type=jnp.float32) + b2_ref[...]
    h2 = jnp.maximum(h2, 0.0)

    out = jnp.dot(w3_ref[...], h2, preferred_element_type=jnp.float32) + b3_ref[...]
    o_ref[...] = out.astype(o_ref.dtype)


@functools.partial(jax.jit, static_argnames=("block_b",))
def ccac_forward(x, w1, b1, w2, b2, w3, b3, *, block_b=256):
    """ModelCCAC forward (num_classes=10). x: [B, 10] -> [B, 11].

    Weights are PyTorch-native [out, in]; biases are [out, 1]. Internally the
    problem runs feature-major ([d, B]) so the batch axis sits on the 128-lane
    axis; the in/out transposes are cheap layout plumbing fused by XLA.
    """
    B = x.shape[0]
    x_t = x.astype(jnp.float32).T  # [D_IN, B]

    B_pad = pl.cdiv(B, block_b) * block_b
    if B_pad != B:
        # Fallback only; prefer B a multiple of block_b so no extra HBM pass.
        x_t = jnp.pad(x_t, ((0, 0), (0, B_pad - B)))

    grid = (B_pad // block_b,)

    flops = 2 * B_pad * (D_IN * D_H1 + D_H1 * D_H2 + D_H2 * D_OUT)
    bytes_accessed = 4 * (
        B_pad * (D_IN + D_OUT)
        + D_H1 * D_IN + D_H1 + D_H2 * D_H1 + D_H2 + D_OUT * D_H2 + D_OUT
    )

    out_t = pl.pallas_call(
        _mlp_kernel,
        out_shape=jax.ShapeDtypeStruct((D_OUT, B_pad), jnp.float32),
        grid_spec=pl.GridSpec(
            grid=grid,
            in_specs=[
                pl.BlockSpec((D_IN, block_b), lambda i: (0, i)),   # x (feature-major)
                pl.BlockSpec((D_H1, D_IN), lambda i: (0, 0)),      # W1  [50,10]
                pl.BlockSpec((D_H1, 1), lambda i: (0, 0)),         # b1  [50,1]
                pl.BlockSpec((D_H2, D_H1), lambda i: (0, 0)),      # W2  [20,50]
                pl.BlockSpec((D_H2, 1), lambda i: (0, 0)),         # b2  [20,1]
                pl.BlockSpec((D_OUT, D_H2), lambda i: (0, 0)),     # W3  [11,20]
                pl.BlockSpec((D_OUT, 1), lambda i: (0, 0)),        # b3  [11,1]
            ],
            out_specs=pl.BlockSpec((D_OUT, block_b), lambda i: (0, i)),
        ),
        compiler_params=pltpu.CompilerParams(
            # Batch tiles are independent -> sharded across v7x's 2 TensorCores.
            dimension_semantics=("parallel",),
        ),
        cost_estimate=pl.CostEstimate(
            flops=flops, transcendentals=0, bytes_accessed=bytes_accessed
        ),
    )(x_t, w1, b1, w2, b2, w3, b3)

    return out_t[:, :B].T  # back to [B, 11]


def init_params(key, dtype=jnp.float32):
    """Deterministic synthetic parameters matching ModelCCAC(num_classes=10).

    Weights in PyTorch layout [out, in]; biases as [out, 1].
    """
    dims = [(D_IN, D_H1), (D_H1, D_H2), (D_H2, D_OUT)]
    params = []
    for fan_in, fan_out in dims:
        key, kw, kb = jax.random.split(key, 3)
        bound = 1.0 / jnp.sqrt(fan_in)
        w = jax.random.uniform(kw, (fan_out, fan_in), dtype, -bound, bound)
        b = jax.random.uniform(kb, (fan_out, 1), dtype, -bound, bound)
        params.extend([w, b])
    return tuple(params)


def _reference_forward(x, w1, b1, w2, b2, w3, b3):
    h1 = jnp.maximum(x @ w1.T + b1[:, 0], 0.0)
    h2 = jnp.maximum(h1 @ w2.T + b2[:, 0], 0.0)
    return h2 @ w3.T + b3[:, 0]


if __name__ == "__main__":
    key = jax.random.PRNGKey(0)
    kx, kp = jax.random.split(key)

    batch = 512     # multiple of block_b -> no padding path, 2 grid steps
    block_b = 256
    x = jax.random.normal(kx, (batch, D_IN), jnp.float32)
    params = init_params(kp)

    out = ccac_forward(x, *params, block_b=block_b)
    out = jax.block_until_ready(out)

    ref = _reference_forward(x, *params)
    assert out.shape == (batch, D_OUT), out.shape
    assert jnp.allclose(out, ref, atol=1e-5, rtol=1e-5), "mismatch vs reference"

    print("KERNEL_OK")
</pallas_src>

<mosaic_0001>
module attributes {stable_mosaic.version = 11 : i64} {
  func.func @_mlp_kernel(%arg0: i32, %arg1: memref<10x256xf32, #tpu.memory_space<vmem>>, %arg2: memref<50x10xf32, #tpu.memory_space<vmem>>, %arg3: memref<50x1xf32, #tpu.memory_space<vmem>>, %arg4: memref<20x50xf32, #tpu.memory_space<vmem>>, %arg5: memref<20x1xf32, #tpu.memory_space<vmem>>, %arg6: memref<11x20xf32, #tpu.memory_space<vmem>>, %arg7: memref<11x1xf32, #tpu.memory_space<vmem>>, %arg8: memref<11x256xf32, #tpu.memory_space<vmem>>) attributes {dimension_semantics = [#tpu.dimension_semantics<parallel>], iteration_bounds = array<i64: 2>, scalar_prefetch = 0 : i64, scratch_operands = 0 : i64, tpu.core_type = #tpu.core_type<tc>, window_params = [{transform_indices = @transform_0, window_bounds = array<i64: 10, 256>}, {pipeline_mode = #tpu.pipeline_mode<synchronous>, transform_indices = @transform_1, window_bounds = array<i64: 50, 10>}, {pipeline_mode = #tpu.pipeline_mode<synchronous>, transform_indices = @transform_2, window_bounds = array<i64: 50, 1>}, {pipeline_mode = #tpu.pipeline_mode<synchronous>, transform_indices = @transform_3, window_bounds = array<i64: 20, 50>}, {pipeline_mode = #tpu.pipeline_mode<synchronous>, transform_indices = @transform_4, window_bounds = array<i64: 20, 1>}, {pipeline_mode = #tpu.pipeline_mode<synchronous>, transform_indices = @transform_5, window_bounds = array<i64: 11, 20>}, {pipeline_mode = #tpu.pipeline_mode<synchronous>, transform_indices = @transform_6, window_bounds = array<i64: 11, 1>}, {transform_indices = @transform_7, window_bounds = array<i64: 11, 256>}]} {
    %c0 = arith.constant 0 : index
    %c0_0 = arith.constant 0 : index
    %0 = vector.load %arg1[%c0, %c0_0] : memref<10x256xf32, #tpu.memory_space<vmem>>, vector<10x256xf32>
    %c0_1 = arith.constant 0 : index
    %c0_2 = arith.constant 0 : index
    %1 = vector.load %arg2[%c0_1, %c0_2] : memref<50x10xf32, #tpu.memory_space<vmem>>, vector<50x10xf32>
    %cst = arith.constant dense<0.000000e+00> : vector<50x256xf32>
    %2 = tpu.matmul %1, %0, %cst {dimension_numbers = #tpu.dot_dimension_numbers<[1], [0], [0], [1], [0, 0, 1, 1], [], []>} : vector<50x10xf32>, vector<10x256xf32>, vector<50x256xf32> -> vector<50x256xf32>
    %c0_3 = arith.constant 0 : index
    %c0_4 = arith.constant 0 : index
    %3 = vector.load %arg3[%c0_3, %c0_4] : memref<50x1xf32, #tpu.memory_space<vmem>>, vector<50x1xf32>
    %4 = vector.broadcast %3 : vector<50x1xf32> to vector<50x256xf32>
    %5 = arith.addf %2, %4 : vector<50x256xf32>
    %cst_5 = arith.constant 0.000000e+00 : f32
    %6 = vector.broadcast %cst_5 : f32 to vector<50x256xf32>
    %7 = arith.maximumf %5, %6 : vector<50x256xf32>
    %c0_6 = arith.constant 0 : index
    %c0_7 = arith.constant 0 : index
    %8 = vector.load %arg4[%c0_6, %c0_7] : memref<20x50xf32, #tpu.memory_space<vmem>>, vector<20x50xf32>
    %cst_8 = arith.constant dense<0.000000e+00> : vector<20x256xf32>
    %9 = tpu.matmul %8, %7, %cst_8 {dimension_numbers = #tpu.dot_dimension_numbers<[1], [0], [0], [1], [0, 0, 1, 1], [], []>} : vector<20x50xf32>, vector<50x256xf32>, vector<20x256xf32> -> vector<20x256xf32>
    %c0_9 = arith.constant 0 : index
    %c0_10 = arith.constant 0 : index
    %10 = vector.load %arg5[%c0_9, %c0_10] : memref<20x1xf32, #tpu.memory_space<vmem>>, vector<20x1xf32>
    %11 = vector.broadcast %10 : vector<20x1xf32> to vector<20x256xf32>
    %12 = arith.addf %9, %11 : vector<20x256xf32>
    %cst_11 = arith.constant 0.000000e+00 : f32
    %13 = vector.broadcast %cst_11 : f32 to vector<20x256xf32>
    %14 = arith.maximumf %12, %13 : vector<20x256xf32>
    %c0_12 = arith.constant 0 : index
    %c0_13 = arith.constant 0 : index
    %15 = vector.load %arg6[%c0_12, %c0_13] : memref<11x20xf32, #tpu.memory_space<vmem>>, vector<11x20xf32>
    %cst_14 = arith.constant dense<0.000000e+00> : vector<11x256xf32>
    %16 = tpu.matmul %15, %14, %cst_14 {dimension_numbers = #tpu.dot_dimension_numbers<[1], [0], [0], [1], [0, 0, 1, 1], [], []>} : vector<11x20xf32>, vector<20x256xf32>, vector<11x256xf32> -> vector<11x256xf32>
    %c0_15 = arith.constant 0 : index
    %c0_16 = arith.constant 0 : index
    %17 = vector.load %arg7[%c0_15, %c0_16] : memref<11x1xf32, #tpu.memory_space<vmem>>, vector<11x1xf32>
    %18 = vector.broadcast %17 : vector<11x1xf32> to vector<11x256xf32>
    %19 = arith.addf %16, %18 : vector<11x256xf32>
    %c0_17 = arith.constant 0 : index
    %c0_18 = arith.constant 0 : index
    %20 = vector.load %arg8[%c0_17, %c0_18] : memref<11x256xf32, #tpu.memory_space<vmem>>, vector<11x256xf32>
    tpu.vector_store %arg8[%c0_17, %c0_18], %19 {strides = array<i32>} : memref<11x256xf32, #tpu.memory_space<vmem>>, vector<11x256xf32>,
    return
  }
  func.func @transform_0(%arg0: i32) -> (i32, i32) {
    %c0_i32 = arith.constant 0 : i32
    %c0_i32_0 = arith.constant 0 : i32
    return %c0_i32, %arg0 : i32, i32
  }
  func.func @transform_1(%arg0: i32) -> (i32, i32) {
    %c0_i32 = arith.constant 0 : i32
    %c0_i32_0 = arith.constant 0 : i32
    %c0_i32_1 = arith.constant 0 : i32
    return %c0_i32, %c0_i32_0 : i32, i32
  }
  func.func @transform_2(%arg0: i32) -> (i32, i32) {
    %c0_i32 = arith.constant 0 : i32
    %c0_i32_0 = arith.constant 0 : i32
    %c0_i32_1 = arith.constant 0 : i32
    return %c0_i32, %c0_i32_0 : i32, i32
  }
  func.func @transform_3(%arg0: i32) -> (i32, i32) {
    %c0_i32 = arith.constant 0 : i32
    %c0_i32_0 = arith.constant 0 : i32
    %c0_i32_1 = arith.constant 0 : i32
    return %c0_i32, %c0_i32_0 : i32, i32
  }
  func.func @transform_4(%arg0: i32) -> (i32, i32) {
    %c0_i32 = arith.constant 0 : i32
    %c0_i32_0 = arith.constant 0 : i32
    %c0_i32_1 = arith.constant 0 : i32
    return %c0_i32, %c0_i32_0 : i32, i32
  }
  func.func @transform_5(%arg0: i32) -> (i32, i32) {
    %c0_i32 = arith.constant 0 : i32
    %c0_i32_0 = arith.constant 0 : i32
    %c0_i32_1 = arith.constant 0 : i32
    return %c0_i32, %c0_i32_0 : i32, i32
  }
  func.func @transform_6(%arg0: i32) -> (i32, i32) {
    %c0_i32 = arith.constant 0 : i32
    %c0_i32_0 = arith.constant 0 : i32
    %c0_i32_1 = arith.constant 0 : i32
    return %c0_i32, %c0_i32_0 : i32, i32
  }
  func.func @transform_7(%arg0: i32) -> (i32, i32) {
    %c0_i32 = arith.constant 0 : i32
    %c0_i32_0 = arith.constant 0 : i32
    return %c0_i32, %arg0 : i32, i32
  }
}

</mosaic_0001>

<bundles_post_ra>
// kernel: ccac_forward.1
= control target key start
LH: loop header
LB: loop body
LE: loop exit
PB: predicated region body
PF: predicated region fallthrough
CT: control target
= control target key end

     0   :  { %12 = vsyncpa [#allocation4], 0  ;;  %s1128_s0 = inlined_call_operand.vmem [shape: f32[10,512], index: 0, kind: input, shape index: {}]   ;;  %s1129_s1 = inlined_call_operand.vmem [shape: f32[50,10], index: 1, kind: input, shape index: {}]   ;;  %s1130_s2 = inlined_call_operand.vmem [shape: f32[50,1], index: 2, kind: input, shape index: {}]   ;;  %s1131_s3 = inlined_call_operand.vmem [shape: f32[20,50], index: 3, kind: input, shape index: {}]   ;;  %s1132_s4 = inlined_call_operand.vmem [shape: f32[20,1], index: 4, kind: input, shape index: {}]   ;;  %s1133_s5 = inlined_call_operand.vmem [shape: f32[11,20], index: 5, kind: input, shape index: {}]   ;;  %s1134_s6 = inlined_call_operand.vmem [shape: f32[11,1], index: 6, kind: input, shape index: {}]   ;;  %s1135_s7 = inlined_call_operand.hbm [shape: f32[11,512], index: 7, kind: output, shape index: {}]  }
   0x1   :  { %14 = vsyncpa [#allocation4 + $0x1], 0  ;;  %s934_s24 = smov 0   ;;  %s936_s25 = smov 0  }
   0x2   :  { %s938_s26 = smov 0   ;;  %s940_s27 = smov 0  }
   0x3 LB: > { %s733_s28 = sadd.s32 4294967295, %s888_s27   ;;  %s734_s29 = sadd.s32 4294967294, %s888_s27   ;;  %s888_s27 = sphi %s940_s27, %s1141_s27   ;;  %s884_s26 = sphi %s938_s26, %s1140_s26   ;;  %s880_s25 = sphi %s936_s25, %s1139_s25   ;;  %s876_s24 = sphi %s934_s24, %s1138_s24  }
   0x4   : > { %s957_s30 = sadd.s32 1, %s888_s27   ;;  %s27_s8 = sadd.s32 1, %s884_s26 }
   0x5   : > { %s24_s9 = ssub.s32 %s888_s27, %s957_s30  ;;  %p34_p0 = scmp.ne.s32.totalorder %s884_s26, %s880_s25 }
   0x6   : > { %p25_p1 = scmp.eq.s32.totalorder %s24_s9, 0  ;;  %p35_p2 = scmp.eq.s32.totalorder %s888_s27, 0 }
   0x7   : > { %p190_p3 = scmp.eq.s32.totalorder %s733_s28, 1  ;;  %p195_p4 = scmp.ne.s32.totalorder %s880_s25, %s876_s24 }
   0x8   : > { %s970_s10 = scalar_select %p25_p1, %s884_s26, %s27_s8  }
   0x9   : > { %p36_p5 = por %p35_p2, %p34_p0  ;;  %p972_p6 = por %p190_p3, %p34_p0 }
   0xa   : > { %p196_p7 = scmp.eq.s32.totalorder %s734_s29, 1  ;;  %p736_p9 = scmp.ge.s32.totalorder %s888_s27, 2 }
   0xc   : > { %p976_p8 = por %p196_p7, %p195_p4  ;;  %230 = sbr.rel (%p736_p9) target bundleno = 25 (0x19), region = 40 }
  0x11   : > { %233 = sbr.rel (!%p36_p5) target bundleno = 25 (0x19), region = 44  ;;  %s235_s13 = sand.u32 (%p36_p5), 1, %s884_s26  }
  0x12   : > { %s778_s14 = sshll.u32 (%p36_p5), %s888_s27, 4  ;;  %s737_s15 = sshll.u32 (%p36_p5), %s235_s13, 5 }
  0x13   : > { %s240_s18 = scalar_lea.vmem (%p36_p5), %s1128_s0, %s778_s14  ;;  %s237_s19 = scalar_lea.vmem (%p36_p5), [#allocation2], %s737_s15 }
  0x14   : > { %v253_v0 = vld [vmem:[%s240_s18] sm:$0xff] (%p36_p5)  ;;  %v255_v1 = vld [vmem:[%s240_s18 + $0x8] sm:$0xff] (%p36_p5) }
  0x15   : > { %v257_v2 = vld [vmem:[%s240_s18 + $0x20] sm:$0xff] (%p36_p5)  ;;  %254 = vst [vmem:[%s237_s19] sm:$0xff] (%p36_p5), %v253_v0  ;;  %v259_v3 = vld [vmem:[%s240_s18 + $0x28] sm:$0xff] (%p36_p5) }
  0x16   : > { %256 = vst [vmem:[%s237_s19 + $0x8] sm:$0xff] %v255_v1 }
  0x17   : > { %258 = vst [vmem:[%s237_s19 + $0x10] sm:$0xff] %v257_v2 }
  0x18   : > { %260 = vst [vmem:[%s237_s19 + $0x18] sm:$0xff] %v259_v3 }
  0x19 PF: > { %p740_p10 = scmp.ge.s32.totalorder %s888_s27, 1  ;;  %p265_p11 = scmp.lt.s32.totalorder %s888_s27, 3 }
  0x1b   : > { %p266_p12 = pnand %p740_p10, %p265_p11 }
  0x1c   : > { %s272_s22 = sand.u32 (!%p266_p12), 1, %s880_s25   ;;  %s779_s21 = sshll.u32 (!%p266_p12), %s733_s28, 4 }
  0x1d   : > { %269 = sbr.rel (%p266_p12) target bundleno = 536 (0x218), region = 67  ;;  %s996_s23 = sshll.u32 (!%p266_p12), %s272_s22, 5 }
  0x1e   : > { %s274_s9 = scalar_lea.vmem (!%p266_p12), [#allocation2], %s996_s23  ;;  %s302_s29 = scalar_lea.vmem (!%p266_p12), [#allocation3], %s996_s23 }
  0x1f   : > { %s662_s13 = scalar_lea.hbm (!%p266_p12), %s1135_s7, %s779_s21  ;;  %s663_s14 = sshll.u32 (!%p266_p12), %s302_s29, 4  ;;  %s1094_s14 = int_to_ptr.vmem [resolvable:$true] %s663_s14 }
  0x20   : > { %s1092_s15 = sshll.u32 (!%p266_p12), %s662_s13, 4  ;;  %s651_s28 = scalar_lea.sflag (!%p266_p12), [#allocation4], %s272_s22  ;;  %s666_s15 = int_to_ptr.hbm [resolvable:$true] %s1092_s15 }
  0x21   : > { %s840_s23 = sshra.s32 (!%p266_p12), %s666_s15, 4  ;;  %s846_s19 = scalar_lea.hbm (!%p266_p12), %s1135_s7, 64  ;;  %s841_s23 = int_to_ptr.hbm [resolvable:$true] %s840_s23 }
  0x22   : > { %v322_v4 = vld [vmem:[%s1130_s2 + $0x30] sm:$0x3]  ;;  %v890_v5 = vmov 0   ;;  %vm380_vm0 = vcmask 1041408   ;;  %v320_v6 = vld [vmem:[%s1130_s2 + $0x20] sm:$0xff]  ;;  %v306_v10 = vld [vmem:[%s274_s9 + $0x8] sm:$0xff]  ;;  %p847_p2 = scmp.lt.s32.totalorder %s841_s23, %s1135_s7 }
  0x23   : > { %823 = vset.pattern.permute.xlu0 %v890_v5  ;;  %824 = vset.pattern.permute.xlu1 %v890_v5  ;;  %v307_v7 = vld [vmem:[%s274_s9 + $0x10] sm:$0x3]  ;;  %v308_v8 = vld [vmem:[%s274_s9 + $0x18] sm:$0x3]  ;;  %v305_v9 = vld [vmem:[%s274_s9] sm:$0xff]  ;;  %vm358_vm1 = vcmask 80896  }
  0x24   : > { %355 = vperm.xlu0 %823, %v322_v4   ;;  %825 = vset.pattern.permute.xlu2 %v890_v5  ;;  %v309_v11 = vld [vmem:[%s1129_s1] sm:$0xff]  ;;  %v321_v12 = vld [vmem:[%s1130_s2 + $0x28] sm:$0xff]  ;;  %v318_v13 = vld [vmem:[%s1130_s2 + $0x10] sm:$0xff]  ;;  %vm498_vm2 = vcmask 408576   ;;  %vm593_vm3 = vcmask 1043456   ;;  %vm586_vm4 = vcmask 162816  }
  0x25   : > { %345 = vperm.xlu1 %824, %v320_v6   ;;  %743 = vmatpush.msk.msra.mxu0 %vm380_vm0, %v307_v7  ;;  %v319_v14 = vld [vmem:[%s1130_s2 + $0x18] sm:$0xff]  ;;  %v310_v15 = vld [vmem:[%s1129_s1 + $0x8] sm:$0xff]  ;;  %v316_v16 = vld [vmem:[%s1130_s2] sm:$0xff]  ;;  %s842_s16 = scalar_lea.hbm %s841_s23, 32 }
  0x26   : > { %751 = vmatpush.msk.msra.mxu1 %vm380_vm0, %v308_v8  ;;  %335 = vperm.xlu2 %825, %v318_v13   ;;  %v317_v17 = vld [vmem:[%s1130_s2 + $0x8] sm:$0xff]  ;;  %v311_v18 = vld [vmem:[%s1129_s1 + $0x10] sm:$0xff]  ;;  %v480_v20 = vld [vmem:[%s1132_s4] sm:$0xff]  ;;  %p843_p13 = scmp.ne.s32.totalorder %s841_s23, %s842_s16  ;;  %p848_p3 = scmp.lt.s32.totalorder %s846_s19, %s842_s16 }
  0x27   : > { %402 = vmatpush.msra.mxu0 %v305_v9  ;;  %v482_v19 = vld [vmem:[%s1132_s4 + $0x10] sm:$0xf]  ;;  %v481_v21 = vld [vmem:[%s1132_s4 + $0x8] sm:$0xff]  ;;  %v312_v22 = vld [vmem:[%s1129_s1 + $0x18] sm:$0xff] }
  0x28   : > { %440 = vmatpush.msra.mxu1 %v306_v10  ;;  %744 = vmatmul.msk.f32.vlgmr.msra.gmra.mxu0 %vm358_vm1, %v309_v11  ;;  %v574_v23 = vld [vmem:[%s1134_s6] sm:$0xff]  ;;  %v575_v24 = vld [vmem:[%s1134_s6 + $0x8] sm:$0x7]  ;;  %v315_v27 = vld [vmem:[%s1129_s1 + $0x30] sm:$0x3]  ;;  %p844_p0 = pnand %p843_p13, %p972_p6  ;;  %p849_p4 = por %p848_p3, %p847_p2 }
  0x29   : > { %752 = vmatmul.msk.f32.vlgmr.msra.gmra.mxu1 %vm358_vm1, %v309_v11  ;;  %v313_v25 = vld [vmem:[%s1129_s1 + $0x20] sm:$0xff]  ;;  %v314_v26 = vld [vmem:[%s1129_s1 + $0x28] sm:$0xff] }
  0x2a   : > { %p845_p1 = pneg %p844_p0 }
  0x2c   : > { %350 = vperm.xlu0 %823, %v321_v12   ;;  %v477_v12 = vld [vmem:[%s1131_s3] sm:$0xff]  ;;  %p850_p5 = pnand %p849_p4, %p845_p1 }
  0x2d   : > { %340 = vperm.xlu1 %824, %v319_v14   ;;  %v478_v14 = vld [vmem:[%s1131_s3 + $0x8] sm:$0xff] }
  0x2e   : > { %330 = vperm.xlu2 %825, %v317_v17  }
  0x30   : > { %745 = vmatmul.msk.f32.gmra.mxu0 %vm358_vm1, %v310_v15 }
  0x31   : > { %753 = vmatmul.msk.f32.gmra.mxu1 %vm358_vm1, %v310_v15  ;;  %v479_v15 = vld [vmem:[%s1131_s3 + $0x10] sm:$0xf] }
  0x34   : > { %325 = vperm.xlu0 %823, %v316_v16  }
  0x35   : > { %495 = vperm.xlu1 %824, %v482_v19  }
  0x36   : > { %490 = vperm.xlu2 %825, %v481_v21  }
  0x38   : > { %746 = vmatmul.msk.f32.gmra.mxu0 %vm358_vm1, %v311_v18 }
  0x39   : > { %754 = vmatmul.msk.f32.gmra.mxu1 %vm358_vm1, %v311_v18 }
  0x3c   : > { %485 = vperm.xlu0 %823, %v480_v20  }
  0x3d   : > { %578 = vperm.xlu1 %824, %v574_v23  }
  0x3e   : > { %583 = vperm.xlu2 %825, %v575_v24  }
  0x40   : > { %747 = vmatmul.msk.f32.gmra.mxu0 %vm358_vm1, %v312_v22 }
  0x41   : > { %755 = vmatmul.msk.f32.gmra.mxu1 %vm358_vm1, %v312_v22 }
  0x48   : > { %748 = vmatmul.msk.f32.gmra.mxu0 %vm358_vm1, %v313_v25 }
  0x49   : > { %756 = vmatmul.msk.f32.gmra.mxu1 %vm358_vm1, %v313_v25 }
  0x50   : > { %749 = vmatmul.msk.f32.gmra.mxu0 %vm358_vm1, %v314_v26 }
  0x51   : > { %757 = vmatmul.msk.f32.gmra.mxu1 %vm358_vm1, %v314_v26 }
  0x58   : > { %750 = vmatmul.msk.f32.gmra.mxu0 %vm358_vm1, %v315_v27 }
  0x59   : > { %758 = vmatmul.msk.f32.gmra.mxu1 %vm358_vm1, %v315_v27 }
  0x80   : > { %v336_v42 = vpop.permute.xlu2 %335 }
  0x88   : > { %v331_v57 = vpop.permute.xlu2 %330 }
  0x90   : > { %v491_v21 = vpop.permute.xlu2 %490 }
  0x96   : > { %v356_v38 = vpop.permute.xlu0 %355 }
  0x97   : > { %v346_v39 = vpop.permute.xlu1 %345 }
  0x9e   : > { %v351_v43 = vpop.permute.xlu0 %350 }
  0x9f   : > { %v341_v48 = vpop.permute.xlu1 %340 }
  0xa5   : > { %v404_v28 = vpop.f32.mrf.mxu0 }
  0xa6   : > { %v442_v29 = vpop.f32.mrf.mxu1  ;;  %v326_v62 = vpop.permute.xlu0 %325 }
  0xa7   : > { %v405_v5 = vadd.f32 %v404_v28, %v326_v62  ;;  %v443_v7 = vadd.f32 %v442_v29, %v326_v62  ;;  %v496_v20 = vpop.permute.xlu1 %495 }
  0xa9   : > { %v463_v11 = vmax.f32 %v405_v5, 0.0  ;;  %v464_v13 = vmax.f32 %v443_v7, 0.0 }
  0xad   : > { %v407_v30 = vpop.f32.mrf.mxu0 }
  0xae   : > { %v445_v31 = vpop.f32.mrf.mxu1  ;;  %v408_v1 = vadd.f32 %v407_v30, %v331_v57  ;;  %v486_v26 = vpop.permute.xlu0 %485 }
  0xaf   : > { %v446_v3 = vadd.f32 %v445_v31, %v331_v57 }
  0xb0   : > { %v465_v9 = vmax.f32 %v408_v1, 0.0 }
  0xb1   : > { %v466_v10 = vmax.f32 %v446_v3, 0.0 }
  0xb5   : > { %v410_v32 = vpop.f32.mrf.mxu0 }
  0xb6   : > { %v448_v33 = vpop.f32.mrf.mxu1  ;;  %v411_v60 = vadd.f32 %v410_v32, %v336_v42 }
  0xb7   : > { %v449_v63 = vadd.f32 %v448_v33, %v336_v42 }
  0xb8   : > { %v467_v6 = vmax.f32 %v411_v60, 0.0 }
  0xb9   : > { %v468_v8 = vmax.f32 %v449_v63, 0.0 }
  0xbd   : > { %v413_v34 = vpop.f32.mrf.mxu0 }
  0xbe   : > { %v451_v35 = vpop.f32.mrf.mxu1  ;;  %v414_v55 = vadd.f32 %v413_v34, %v341_v48 }
  0xbf   : > { %v452_v58 = vadd.f32 %v451_v35, %v341_v48 }
  0xc0   : > { %v469_v2 = vmax.f32 %v414_v55, 0.0 }
  0xc1   : > { %v470_v4 = vmax.f32 %v452_v58, 0.0 }
  0xc5   : > { %v416_v36 = vpop.f32.mrf.mxu0 }
  0xc6   : > { %v454_v37 = vpop.f32.mrf.mxu1  ;;  %v417_v51 = vadd.f32 %v416_v36, %v346_v39  ;;  %v572_v36 = vld [vmem:[%s1133_s5] sm:$0xff] }
  0xc7   : > { %v455_v53 = vadd.f32 %v454_v37, %v346_v39  ;;  %v579_v39 = vpop.permute.xlu1 %578 }
  0xc8   : > { %v471_v61 = vmax.f32 %v417_v51, 0.0 }
  0xc9   : > { %v472_v0 = vmax.f32 %v455_v53, 0.0 }
  0xcd   : > { %v419_v40 = vpop.f32.mrf.mxu0 }
  0xce   : > { %v457_v41 = vpop.f32.mrf.mxu1  ;;  %v420_v45 = vadd.f32 %v419_v40, %v351_v43 }
  0xcf   : > { %v458_v49 = vadd.f32 %v457_v41, %v351_v43 }
  0xd0   : > { %v473_v56 = vmax.f32 %v420_v45, 0.0 }
  0xd1   : > { %v474_v59 = vmax.f32 %v458_v49, 0.0 }
  0xd5   : > { %v422_v44 = vpop.f32.mrf.mxu0 }
  0xd6   : > { %v423_v46 = vadd.f32 %v422_v44, %v356_v38  ;;  %v460_v47 = vpop.f32.mrf.mxu1  ;;  %v584_v44 = vpop.permute.xlu2 %583 }
  0xd7   : > { %v461_v50 = vadd.f32 %v460_v47, %v356_v38  ;;  %v573_v38 = vld [vmem:[%s1133_s5 + $0x8] sm:$0x7] }
  0xd8   : > { %v475_v52 = vmax.f32 %v423_v46, 0.0 }
  0xd9   : > { %v476_v54 = vmax.f32 %v461_v50, 0.0 }
  0xda   : > { %759 = vmatpush.msk.msra.mxu2 %vm380_vm0, %v475_v52 }
  0xdb   : > { %763 = vmatpush.msk.msra.mxu3 %vm380_vm0, %v476_v54 }
  0xdc   : > { %524 = vmatpush.msra.mxu2 %v473_v56 }
  0xdd   : > { %550 = vmatpush.msra.mxu3 %v474_v59 }
  0xde   : > { %525 = vmatpush.msra.mxu2 %v471_v61 }
  0xdf   : > { %551 = vmatpush.msra.mxu3 %v472_v0 }
  0xe0   : > { %526 = vmatpush.msra.mxu2 %v469_v2 }
  0xe1   : > { %552 = vmatpush.msra.mxu3 %v470_v4 }
  0xe2   : > { %527 = vmatpush.msra.mxu2 %v467_v6 }
  0xe3   : > { %553 = vmatpush.msra.mxu3 %v468_v8 }
  0xe4   : > { %528 = vmatpush.msra.mxu2 %v465_v9 }
  0xe5   : > { %554 = vmatpush.msra.mxu3 %v466_v10 }
  0xe6   : > { %529 = vmatpush.msra.mxu2 %v463_v11 }
  0xe7   : > { %555 = vmatpush.msra.mxu3 %v464_v13  ;;  %760 = vmatmul.msk.f32.vlgmr.msra.gmra.mxu2 %vm498_vm2, %v477_v12 }
  0xe8   : > { %764 = vmatmul.msk.f32.vlgmr.msra.gmra.mxu3 %vm498_vm2, %v477_v12 }
  0xef   : > { %761 = vmatmul.msk.f32.gmra.mxu2 %vm498_vm2, %v478_v14 }
  0xf0   : > { %765 = vmatmul.msk.f32.gmra.mxu3 %vm498_vm2, %v478_v14 }
  0xf7   : > { %762 = vmatmul.msk.f32.gmra.mxu2 %vm498_vm2, %v479_v15 }
  0xf8   : > { %766 = vmatmul.msk.f32.gmra.mxu3 %vm498_vm2, %v479_v15 }
 0x16a   : > { %v531_v16 = vpop.f32.mrf.mxu2 }
 0x16b   : > { %v557_v17 = vpop.f32.mrf.mxu3  ;;  %v532_v29 = vadd.f32 %v531_v16, %v486_v26 }
 0x16c   : > { %v558_v31 = vadd.f32 %v557_v17, %v486_v26 }
 0x16d   : > { %v566_v35 = vmax.f32 %v532_v29, 0.0 }
 0x16e   : > { %v567_v37 = vmax.f32 %v558_v31, 0.0 }
 0x172   : > { %v534_v18 = vpop.f32.mrf.mxu2 }
 0x173   : > { %v560_v19 = vpop.f32.mrf.mxu3  ;;  %v535_v23 = vadd.f32 %v534_v18, %v491_v21 }
 0x174   : > { %v561_v27 = vadd.f32 %v560_v19, %v491_v21 }
 0x175   : > { %v568_v33 = vmax.f32 %v535_v23, 0.0 }
 0x176   : > { %v569_v34 = vmax.f32 %v561_v27, 0.0 }
 0x17a   : > { %v537_v22 = vpop.f32.mrf.mxu2 }
 0x17b   : > { %v538_v24 = vadd.f32 %v537_v22, %v496_v20  ;;  %v563_v25 = vpop.f32.mrf.mxu3 }
 0x17c   : > { %v564_v28 = vadd.f32 %v563_v25, %v496_v20 }
 0x17d   : > { %v570_v30 = vmax.f32 %v538_v24, 0.0 }
 0x17e   : > { %v571_v32 = vmax.f32 %v564_v28, 0.0 }
 0x17f   : > { %767 = vmatpush.msk.msrb.mxu2 %vm593_vm3, %v570_v30 }
 0x180   : > { %770 = vmatpush.msk.msrb.mxu3 %vm593_vm3, %v571_v32 }
 0x181   : > { %614 = vmatpush.msrb.mxu2 %v568_v33 }
 0x182   : > { %637 = vmatpush.msrb.mxu3 %v569_v34 }
 0x183   : > { %615 = vmatpush.msrb.mxu2 %v566_v35 }
 0x184   : > { %638 = vmatpush.msrb.mxu3 %v567_v37  ;;  %768 = vmatmul.msk.f32.vlgmr.msrb.gmra.mxu2 %vm586_vm4, %v572_v36 }
 0x185   : > { %771 = vmatmul.msk.f32.vlgmr.msrb.gmra.mxu3 %vm586_vm4, %v572_v36 }
 0x18c   : > { %769 = vmatmul.msk.f32.gmra.mxu2 %vm586_vm4, %v573_v38 }
 0x18d   : > { %772 = vmatmul.msk.f32.gmra.mxu3 %vm586_vm4, %v573_v38 }
 0x207   : > { %v617_v40 = vpop.f32.mrf.mxu2 }
 0x208   : > { %v618_v41 = vadd.f32 %v617_v40, %v579_v39  ;;  %v640_v42 = vpop.f32.mrf.mxu3 }
 0x209   : > { %v641_v43 = vadd.f32 %v640_v42, %v579_v39 }
 0x20a   : > { %646 = vst [vmem:[%s302_s29] sm:$0xff] %v618_v41 }
 0x20b   : > { %647 = vst [vmem:[%s302_s29 + $0x8] sm:$0xff] %v641_v43 }
 0x20f   : > { %v620_v45 = vpop.f32.mrf.mxu2 }
 0x210   : > { %v621_v46 = vadd.f32 %v620_v45, %v584_v44  ;;  %v643_v47 = vpop.f32.mrf.mxu3 }
 0x211   : > { %v644_v48 = vadd.f32 %v643_v47, %v584_v44 }
 0x212   : > { %648 = vst [vmem:[%s302_s29 + $0x10] sm:$0x7] %v621_v46 }
 0x213   : > { %649 = vst [vmem:[%s302_s29 + $0x18] sm:$0x7] %v644_v48 }
 0x214   : > { %853 = shalt.err (!%p850_p5)
}
 0x215   : > { %s891_s22 = smov 256   ;;  %s892_s29 = smov 512  }
 0x216   : > { %s893_s8 = smov 16  }
 0x217   : > { %780 = dma.vmem_to_hbm [thread:$0]  (%p972_p6), %s1094_s14, 512, %s666_s15, %s651_s28, %s891_s22, %s892_s29, %s893_s8  }
 0x218 PF: > { %s680_s9 = sand.u32 1, %s876_s24   ;;  %p783_p7 = pnand %p736_p9, %p976_p8 }
 0x219   : > { %s681_s13 = scalar_lea.sflag [#allocation4], %s680_s9 }
 0x21a   : > { %p784_p10 = pneg %p783_p7 }
 0x21c   : > { %871 = dma.done.wait (%p784_p10), %s681_s13, 512  }
 0x21d   : > { %873 = vsyncadd (%p784_p10), %s681_s13, 4294966784  ;;  %p17_p11 = scmp.ge.s32.totalorder %s957_s30, 4   ;;  %s1138_s24 = smov %s880_s25 }
 0x21e   : > { %s1139_s25 = smov %s884_s26  ;;  %s1140_s26 = smov %s970_s10 }
 0x21f   : > { %s1141_s27 = smov %s957_s30  ;;  %19 = sbr.rel (!%p17_p11) target bundleno = 3 (0x3), region = 111 }
 0x224   :  { %687 = vsyncpa [#allocation4], 1 }
 0x225   :  { %689 = vsyncpa [#allocation4 + $0x1], 1 }

</bundles_post_ra>
